<compile_context>
chip_gen: v7x
topology: tpu7x:2x2x1
jax: 0.10.0
libtpu: 0.0.40
codegen_flags: <defaults>
</compile_context>

<pallas_src>
import jax
import jax.numpy as jnp
from jax.experimental import pallas as pl
from jax.experimental.pallas import tpu as pltpu


# ---------------------------------------------------------------------------
# Math helpers (exact replica of the PyTorch GELU tanh approximation, in f32).
# ---------------------------------------------------------------------------
def _gelu_tanh(x):
    c = jnp.sqrt(2.0 / jnp.pi).astype(x.dtype)
    return 0.5 * x * (1.0 + jnp.tanh(c * (x + 0.044715 * x * x * x)))


def _hidden_act(x_tile, w1_tile, b1_tile):
    # First matmul on the MXU in native dtype, f32 accumulation; bias + GELU in f32.
    h = jnp.dot(x_tile, w1_tile, preferred_element_type=jnp.float32)
    return _gelu_tanh(h + b1_tile.astype(jnp.float32))


# ---------------------------------------------------------------------------
# Kernels.
# ---------------------------------------------------------------------------
def _ffn_fused_kernel(x_ref, w1_ref, b1_ref, w2_ref, b2_ref, o_ref):
    # Single pass: whole hidden dim resident in VMEM (th == H_pad).
    h = _hidden_act(x_ref[...], w1_ref[...], b1_ref[...])
    out = jnp.dot(h.astype(w2_ref.dtype), w2_ref[...],
                  preferred_element_type=jnp.float32)
    o_ref[...] = (out + b2_ref[...].astype(jnp.float32)).astype(o_ref.dtype)


def _ffn_stream_kernel_f32out(x_ref, w1_ref, b1_ref, w2_ref, b2_ref, o_ref):
    # Streamed H chunks; output dtype is f32 -> accumulate directly into o_ref
    # (its block index is constant along k, so it stays VMEM-resident).
    k = pl.program_id(1)

    @pl.when(k == 0)
    def _init():
        o_ref[...] = jnp.zeros_like(o_ref)

    h = _hidden_act(x_ref[...], w1_ref[...], b1_ref[...])
    o_ref[...] += jnp.dot(h.astype(w2_ref.dtype), w2_ref[...],
                          preferred_element_type=jnp.float32)

    @pl.when(k == pl.num_programs(1) - 1)
    def _finalize():
        o_ref[...] += b2_ref[...].astype(jnp.float32)


def _ffn_stream_kernel_scratch(x_ref, w1_ref, b1_ref, w2_ref, b2_ref, o_ref,
                               acc_ref):
    # Streamed H chunks; non-f32 output -> f32 scratch accumulator.
    k = pl.program_id(1)

    @pl.when(k == 0)
    def _init():
        acc_ref[...] = jnp.zeros_like(acc_ref)

    h = _hidden_act(x_ref[...], w1_ref[...], b1_ref[...])
    acc_ref[...] += jnp.dot(h.astype(w2_ref.dtype), w2_ref[...],
                            preferred_element_type=jnp.float32)

    @pl.when(k == pl.num_programs(1) - 1)
    def _finalize():
        o_ref[...] = (acc_ref[...] + b2_ref[...].astype(jnp.float32)
                      ).astype(o_ref.dtype)


# ---------------------------------------------------------------------------
# Tiling / budgeting helpers.
# ---------------------------------------------------------------------------
def _round_up(x, m):
    return ((x + m - 1) // m) * m


def _pad2d(a, rows, cols):
    r, c = a.shape
    if r == rows and c == cols:
        return a
    return jnp.pad(a, ((0, rows - r), (0, cols - c)))


def _vmem_capacity_bytes():
    """Physical VMEM per TensorCore (v5e/v6e: 128 MiB, v7x: 64 MiB)."""
    try:
        cap = getattr(pltpu.get_tpu_info(), "vmem_capacity_bytes", None)
        if cap:
            return int(cap)
    except Exception:
        pass
    try:
        kind = jax.devices()[0].device_kind.lower()
        if "v5" in kind or "v6" in kind:
            return 128 * 1024 * 1024
    except Exception:
        pass
    return 64 * 1024 * 1024  # conservative (works on v7x)


def _vmem_bytes(tm, th, E_pad, x_isz, w_isz, out_isz, use_acc):
    """Exact per-config VMEM need: 2 buffers per in/out block (+ optional acc)."""
    b = 2 * tm * E_pad * x_isz        # x tile
    b += 2 * E_pad * th * w_isz       # W1 chunk
    b += 2 * 8 * th * w_isz           # b1 chunk ((1, th) rounds to 8 sublanes)
    b += 2 * th * E_pad * w_isz       # W2 chunk
    b += 2 * 8 * E_pad * w_isz        # b2
    b += 2 * tm * E_pad * out_isz     # out tile
    if use_acc:
        b += tm * E_pad * 4           # f32 accumulator scratch
    return b


def _pick_tiles(M, E_pad, H_pad, x_isz, w_isz, out_isz, scratch_acc, budget):
    # Row-tile candidates: large for weight reuse; keep >= 2 tiles (megacore)
    # when M permits; dtype-native sublane alignment for small M.
    sub = {4: 8, 2: 16, 1: 32}.get(x_isz, 8)
    if M <= 256:
        tm_cands = [max(sub, _round_up(M, sub))]
    else:
        tm_cands = [c for c in (1024, 512, 256) if pl.cdiv(M, c) >= 2]
        if not tm_cands:
            tm_cands = [256]

    # Hidden-chunk candidates: must divide H_pad; prefer whole-H (fused path),
    # then large 256-aligned chunks.
    th_cands = []
    for c in (H_pad, 4096, 2048, 1024, 512, 256, 128):
        if c <= H_pad and H_pad % c == 0 and c not in th_cands:
            th_cands.append(c)

    best = None
    for tm in tm_cands:
        for th in th_cands:
            use_acc = scratch_acc and (th != H_pad)
            if _vmem_bytes(tm, th, E_pad, x_isz, w_isz, out_isz,
                           use_acc) <= budget:
                if best is None:
                    best = (tm, th)
                if th >= min(512, H_pad):
                    return tm, th
                break  # largest fitting th for this tm is small; try smaller tm
    if best is not None:
        return best
    return tm_cands[-1], th_cands[-1]  # fallback; may spill on extreme shapes


# ---------------------------------------------------------------------------
# Public module.
# ---------------------------------------------------------------------------
class FeedForward:
    """Pallas TPU FeedForward:  y = GELU_tanh(x @ W1 + b1) @ W2 + b2.

    Weights use the (in, out) layout (== PyTorch nn.Linear's x @ W.T + b) and
    are padded to lane/MXU-aligned shapes ONCE at construction (hoisted out of
    the per-call hot path).  Set compute_dtype=jnp.bfloat16 to trade a little
    precision for ~4x MXU throughput / half the weight bandwidth.
    """

    def __init__(self, w1, b1, w2, b2, *, compute_dtype=None):
        E, H = w1.shape
        assert w2.shape == (H, E) and b1.shape == (H,) and b2.shape == (E,)
        self.E, self.H = E, H
        self.E_pad = _round_up(E, 128)
        self.H_pad = _round_up(H, 128)
        if compute_dtype is not None:
            w1 = w1.astype(compute_dtype)
            w2 = w2.astype(compute_dtype)
        self.w1 = _pad2d(w1, self.E_pad, self.H_pad)
        self.b1 = _pad2d(b1.reshape(1, H), 1, self.H_pad)
        self.w2 = _pad2d(w2, self.H_pad, self.E_pad)
        self.b2 = _pad2d(b2.reshape(1, E), 1, self.E_pad)
        self.compute_dtype = compute_dtype

    def __call__(self, x, *, tm=None, th=None):
        B, T, E = x.shape
        assert E == self.E
        M = B * T
        E_pad, H_pad = self.E_pad, self.H_pad
        out_dtype = x.dtype

        xin = x if self.compute_dtype is None else x.astype(self.compute_dtype)
        x2d = xin.reshape(M, E)

        x_isz = jnp.dtype(x2d.dtype).itemsize
        w_isz = jnp.dtype(self.w1.dtype).itemsize
        out_isz = jnp.dtype(out_dtype).itemsize
        scratch_acc = jnp.dtype(out_dtype) != jnp.dtype(jnp.float32)

        cap = _vmem_capacity_bytes()
        budget = int(cap * 0.82)

        tm_sel, th_sel = _pick_tiles(M, E_pad, H_pad, x_isz, w_isz, out_isz,
                                     scratch_acc, budget)
        tm = tm_sel if tm is None else tm
        th = th_sel if th is None else th
        assert H_pad % th == 0

        M_pad = _round_up(M, tm)
        if M_pad != M or E_pad != E:
            x2d = jnp.pad(x2d, ((0, M_pad - M), (0, E_pad - E)))

        fused = (th == H_pad)
        use_acc = scratch_acc and not fused
        need = _vmem_bytes(tm, th, E_pad, x_isz, w_isz, out_isz, use_acc)
        vmem_limit = int(min(cap * 0.85, max(need + 8 * 1024 * 1024,
                                             32 * 1024 * 1024)))

        if fused:
            out2d = pl.pallas_call(
                _ffn_fused_kernel,
                out_shape=jax.ShapeDtypeStruct((M_pad, E_pad), out_dtype),
                grid_spec=pltpu.PrefetchScalarGridSpec(
                    num_scalar_prefetch=0,
                    grid=(M_pad // tm,),
                    in_specs=[
                        pl.BlockSpec((tm, E_pad),    lambda i: (i, 0)),  # x
                        pl.BlockSpec((E_pad, H_pad), lambda i: (0, 0)),  # W1
                        pl.BlockSpec((1, H_pad),     lambda i: (0, 0)),  # b1
                        pl.BlockSpec((H_pad, E_pad), lambda i: (0, 0)),  # W2
                        pl.BlockSpec((1, E_pad),     lambda i: (0, 0)),  # b2
                    ],
                    out_specs=pl.BlockSpec((tm, E_pad), lambda i: (i, 0)),
                ),
                compiler_params=pltpu.CompilerParams(
                    dimension_semantics=("parallel",),
                    vmem_limit_bytes=vmem_limit,
                ),
            )(x2d, self.w1, self.b1, self.w2, self.b2)
        else:
            kernel = (_ffn_stream_kernel_scratch if scratch_acc
                      else _ffn_stream_kernel_f32out)
            scratch = ([pltpu.VMEM((tm, E_pad), jnp.float32)]
                       if scratch_acc else [])
            # TODO(synk): on v7x, sweep pipeline_mode=pl.Buffered(3) on the
            # W1/W2 specs if a profile shows exposed DMA at k-step boundaries.
            out2d = pl.pallas_call(
                kernel,
                out_shape=jax.ShapeDtypeStruct((M_pad, E_pad), out_dtype),
                grid_spec=pltpu.PrefetchScalarGridSpec(
                    num_scalar_prefetch=0,
                    grid=(M_pad // tm, H_pad // th),  # reduction axis (H) last
                    in_specs=[
                        pl.BlockSpec((tm, E_pad), lambda i, k: (i, 0)),  # x
                        pl.BlockSpec((E_pad, th), lambda i, k: (0, k)),  # W1
                        pl.BlockSpec((1, th),     lambda i, k: (0, k)),  # b1
                        pl.BlockSpec((th, E_pad), lambda i, k: (k, 0)),  # W2
                        pl.BlockSpec((1, E_pad),  lambda i, k: (0, 0)),  # b2
                    ],
                    out_specs=pl.BlockSpec((tm, E_pad), lambda i, k: (i, 0)),
                    scratch_shapes=scratch,
                ),
                compiler_params=pltpu.CompilerParams(
                    dimension_semantics=("parallel", "arbitrary"),
                    vmem_limit_bytes=vmem_limit,
                ),
            )(x2d, self.w1, self.b1, self.w2, self.b2)

        return out2d[:M, :E].reshape(B, T, E)


def feed_forward(x, w1, b1, w2, b2, **kwargs):
    """One-shot convenience wrapper (prefer FeedForward() to hoist padding)."""
    return FeedForward(w1, b1, w2, b2)(x, **kwargs)


def feed_forward_ref(x, w1, b1, w2, b2):
    h = jnp.dot(x, w1) + b1
    h = _gelu_tanh(h.astype(jnp.float32)).astype(x.dtype)
    return jnp.dot(h, w2) + b2


if __name__ == "__main__":
    # cfg-like small shapes: emb_dim=64 -> hidden=4*64=256, batch=2, seq=8
    B, T, E = 2, 8, 64
    H = 4 * E

    key = jax.random.PRNGKey(0)
    kx, k1, kb1, k2, kb2 = jax.random.split(key, 5)

    x = jax.random.normal(kx, (B, T, E), dtype=jnp.float32)
    # Parameters in (in, out) layout so the kernel computes x @ W + b
    # (== PyTorch's x @ W.T + b for nn.Linear(E, 4E) / nn.Linear(4E, E)).
    w1 = jax.random.normal(k1, (E, H), dtype=jnp.float32) * 0.02
    b1 = jax.random.normal(kb1, (H,), dtype=jnp.float32) * 0.02
    w2 = jax.random.normal(k2, (H, E), dtype=jnp.float32) * 0.02
    b2 = jax.random.normal(kb2, (E,), dtype=jnp.float32) * 0.02

    ffn = FeedForward(w1, b1, w2, b2)      # padding hoisted here, once
    out = ffn(x)
    out = jax.block_until_ready(out)

    ref = feed_forward_ref(x, w1, b1, w2, b2)
    assert out.shape == (B, T, E)
    assert jnp.allclose(out, ref, atol=1e-4, rtol=1e-4), "mismatch vs reference"

    print("KERNEL_OK")
</pallas_src>

<mosaic_0001>
module attributes {stable_mosaic.version = 11 : i64} {
  func.func @_ffn_fused_kernel(%arg0: i32, %arg1: memref<16x128xf32, #tpu.memory_space<vmem>>, %arg2: memref<128x256xf32, #tpu.memory_space<vmem>>, %arg3: memref<1x256xf32, #tpu.memory_space<vmem>>, %arg4: memref<256x128xf32, #tpu.memory_space<vmem>>, %arg5: memref<1x128xf32, #tpu.memory_space<vmem>>, %arg6: memref<16x128xf32, #tpu.memory_space<vmem>>) attributes {dimension_semantics = [#tpu.dimension_semantics<parallel>], iteration_bounds = array<i64: 1>, scalar_prefetch = 0 : i64, scratch_operands = 0 : i64, tpu.core_type = #tpu.core_type<tc>, window_params = [{transform_indices = @transform_0, window_bounds = array<i64: 16, 128>}, {pipeline_mode = #tpu.pipeline_mode<synchronous>, transform_indices = @transform_1, window_bounds = array<i64: 128, 256>}, {pipeline_mode = #tpu.pipeline_mode<synchronous>, transform_indices = @transform_2, window_bounds = array<i64: 1, 256>}, {pipeline_mode = #tpu.pipeline_mode<synchronous>, transform_indices = @transform_3, window_bounds = array<i64: 256, 128>}, {pipeline_mode = #tpu.pipeline_mode<synchronous>, transform_indices = @transform_4, window_bounds = array<i64: 1, 128>}, {transform_indices = @transform_5, window_bounds = array<i64: 16, 128>}]} {
    %c0 = arith.constant 0 : index
    %c0_0 = arith.constant 0 : index
    %0 = vector.load %arg1[%c0, %c0_0] : memref<16x128xf32, #tpu.memory_space<vmem>>, vector<16x128xf32>
    %c0_1 = arith.constant 0 : index
    %c0_2 = arith.constant 0 : index
    %1 = vector.load %arg2[%c0_1, %c0_2] : memref<128x256xf32, #tpu.memory_space<vmem>>, vector<128x256xf32>
    %c0_3 = arith.constant 0 : index
    %c0_4 = arith.constant 0 : index
    %2 = vector.load %arg3[%c0_3, %c0_4] : memref<1x256xf32, #tpu.memory_space<vmem>>, vector<1x256xf32>
    %cst = arith.constant dense<0.000000e+00> : vector<16x256xf32>
    %3 = tpu.matmul %0, %1, %cst {dimension_numbers = #tpu.dot_dimension_numbers<[1], [0], [0], [1], [0, 0, 1, 1], [], []>} : vector<16x128xf32>, vector<128x256xf32>, vector<16x256xf32> -> vector<16x256xf32>
    %4 = vector.broadcast %2 : vector<1x256xf32> to vector<16x256xf32>
    %5 = arith.addf %3, %4 : vector<16x256xf32>
    %cst_5 = arith.constant 0.636619746 : f32
    %6 = math.sqrt %cst_5 : f32
    %cst_6 = arith.constant 5.000000e-01 : f32
    %7 = vector.broadcast %cst_6 : f32 to vector<16x256xf32>
    %8 = arith.mulf %7, %5 : vector<16x256xf32>
    %cst_7 = arith.constant 4.471500e-02 : f32
    %9 = vector.broadcast %cst_7 : f32 to vector<16x256xf32>
    %10 = arith.mulf %9, %5 : vector<16x256xf32>
    %11 = arith.mulf %10, %5 : vector<16x256xf32>
    %12 = arith.mulf %11, %5 : vector<16x256xf32>
    %13 = arith.addf %5, %12 : vector<16x256xf32>
    %14 = vector.broadcast %6 : f32 to vector<16x256xf32>
    %15 = arith.mulf %14, %13 : vector<16x256xf32>
    %16 = math.tanh %15 : vector<16x256xf32>
    %cst_8 = arith.constant 1.000000e+00 : f32
    %17 = vector.broadcast %cst_8 : f32 to vector<16x256xf32>
    %18 = arith.addf %17, %16 : vector<16x256xf32>
    %19 = arith.mulf %8, %18 : vector<16x256xf32>
    %c0_9 = arith.constant 0 : index
    %c0_10 = arith.constant 0 : index
    %20 = vector.load %arg4[%c0_9, %c0_10] : memref<256x128xf32, #tpu.memory_space<vmem>>, vector<256x128xf32>
    %cst_11 = arith.constant dense<0.000000e+00> : vector<16x128xf32>
    %21 = tpu.matmul %19, %20, %cst_11 {dimension_numbers = #tpu.dot_dimension_numbers<[1], [0], [0], [1], [0, 0, 1, 1], [], []>} : vector<16x256xf32>, vector<256x128xf32>, vector<16x128xf32> -> vector<16x128xf32>
    %c0_12 = arith.constant 0 : index
    %c0_13 = arith.constant 0 : index
    %22 = vector.load %arg5[%c0_12, %c0_13] : memref<1x128xf32, #tpu.memory_space<vmem>>, vector<1x128xf32>
    %23 = vector.broadcast %22 : vector<1x128xf32> to vector<16x128xf32>
    %24 = arith.addf %21, %23 : vector<16x128xf32>
    %c0_14 = arith.constant 0 : index
    %c0_15 = arith.constant 0 : index
    %25 = vector.load %arg6[%c0_14, %c0_15] : memref<16x128xf32, #tpu.memory_space<vmem>>, vector<16x128xf32>
    tpu.vector_store %arg6[%c0_14, %c0_15], %24 {strides = array<i32>} : memref<16x128xf32, #tpu.memory_space<vmem>>, vector<16x128xf32>,
    return
  }
  func.func @transform_0(%arg0: i32) -> (i32, i32) {
    %c0_i32 = arith.constant 0 : i32
    %c0_i32_0 = arith.constant 0 : i32
    return %arg0, %c0_i32 : i32, i32
  }
  func.func @transform_1(%arg0: i32) -> (i32, i32) {
    %c0_i32 = arith.constant 0 : i32
    %c0_i32_0 = arith.constant 0 : i32
    %c0_i32_1 = arith.constant 0 : i32
    return %c0_i32, %c0_i32_0 : i32, i32
  }
  func.func @transform_2(%arg0: i32) -> (i32, i32) {
    %c0_i32 = arith.constant 0 : i32
    %c0_i32_0 = arith.constant 0 : i32
    %c0_i32_1 = arith.constant 0 : i32
    return %c0_i32, %c0_i32_0 : i32, i32
  }
  func.func @transform_3(%arg0: i32) -> (i32, i32) {
    %c0_i32 = arith.constant 0 : i32
    %c0_i32_0 = arith.constant 0 : i32
    %c0_i32_1 = arith.constant 0 : i32
    return %c0_i32, %c0_i32_0 : i32, i32
  }
  func.func @transform_4(%arg0: i32) -> (i32, i32) {
    %c0_i32 = arith.constant 0 : i32
    %c0_i32_0 = arith.constant 0 : i32
    %c0_i32_1 = arith.constant 0 : i32
    return %c0_i32, %c0_i32_0 : i32, i32
  }
  func.func @transform_5(%arg0: i32) -> (i32, i32) {
    %c0_i32 = arith.constant 0 : i32
    %c0_i32_0 = arith.constant 0 : i32
    return %arg0, %c0_i32 : i32, i32
  }
}

</mosaic_0001>

<bundles_post_ra>
// kernel: tpu_custom_call.1
= control target key start
LH: loop header
LB: loop body
LE: loop exit
PB: predicated region body
PF: predicated region fallthrough
CT: control target
= control target key end

     0   :  { %10 = vsyncpa [#allocation3], 0  ;;  %s673_s0 = inlined_call_operand.hbm [shape: f32[16,128], index: 0, kind: input, shape index: {}]   ;;  %s674_s1 = inlined_call_operand.hbm [shape: f32[128,256], index: 1, kind: input, shape index: {}]   ;;  %s675_s2 = inlined_call_operand.vmem [shape: f32[1,256], index: 2, kind: input, shape index: {}]   ;;  %s676_s3 = inlined_call_operand.hbm [shape: f32[256,128], index: 3, kind: input, shape index: {}]   ;;  %s677_s4 = inlined_call_operand.vmem [shape: f32[1,128], index: 4, kind: input, shape index: {}]   ;;  %s678_s5 = inlined_call_operand.hbm [shape: f32[16,128], index: 5, kind: output, shape index: {}]  }
   0x1   :  { %11 = vsyncpa [#allocation6], 0 }
   0x2   :  { %12 = vsyncpa [#allocation4], 0  ;;  %s569_s18 = smov [#allocation5]   ;;  %s475_s22 = scalar_lea.hbm %s674_s1, 4096 }
   0x3   :  { %s30_s19 = sshll.u32 %s569_s18, 4  ;;  %p476_p0 = scmp.ne.s32.totalorder %s674_s1, %s475_s22  ;;  %s31_s19 = int_to_ptr.vmem [resolvable:$true] %s30_s19 }
   0x4   :  { %p479_p1 = scmp.lt.u32.totalorder %s475_s22, %s674_s1 }
   0x6   :  { %p481_p2 = pnand %p479_p1, %p476_p0 }
   0x8   :  { %484 = shalt.err (!%p481_p2)
}
   0x9   :  { %s485_s27 = scalar_lea.vmem %s31_s19, 4096  ;;  %p490_p4 = scmp.lt.s32.totalorder %s31_s19, %s31_s19 }
   0xa   :  { %p486_p3 = scmp.ne.s32.totalorder %s31_s19, %s485_s27  ;;  %p491_p5 = scmp.lt.s32.totalorder %s485_s27, %s485_s27 }
   0xc   :  { %p492_p6 = por %p491_p5, %p490_p4 }
   0xe   :  { %p493_p7 = pnand %p492_p6, %p486_p3 }
  0x10   :  { %496 = shalt.err (!%p493_p7)
}
  0x11   :  { %s570_s28 = smov 256   ;;  %s571_s29 = smov 16  }
  0x12   :  { %36 = dma.hbm_to_vmem [thread:$0]  %s674_s1, 4096, %s31_s19, [#allocation6], %s570_s28, %s570_s28, %s571_s29  }
  0x13   :  { %s572_s7 = smov [#allocation2]   ;;  %s497_s11 = scalar_lea.hbm %s673_s0, 256 }
  0x14   :  { %s18_s8 = sshll.u32 %s572_s7, 4  ;;  %p498_p8 = scmp.ne.s32.totalorder %s673_s0, %s497_s11  ;;  %s19_s8 = int_to_ptr.vmem [resolvable:$true] %s18_s8 }
  0x15   :  { %p501_p9 = scmp.lt.u32.totalorder %s497_s11, %s673_s0 }
  0x17   :  { %p503_p10 = pnand %p501_p9, %p498_p8 }
  0x19   :  { %506 = shalt.err (!%p503_p10)
}
  0x1a   :  { %s507_s16 = scalar_lea.vmem %s19_s8, 256  ;;  %p512_p12 = scmp.lt.s32.totalorder %s19_s8, %s19_s8 }
  0x1b   :  { %p508_p11 = scmp.ne.s32.totalorder %s19_s8, %s507_s16  ;;  %p513_p13 = scmp.lt.s32.totalorder %s507_s16, %s507_s16 }
  0x1d   :  { %p514_p0 = por %p513_p13, %p512_p12 }
  0x1f   :  { %p515_p1 = pnand %p514_p0, %p508_p11 }
  0x21   :  { %518 = shalt.err (!%p515_p1)
}
  0x22   :  { %s573_s1 = smov 128   ;;  %s574_s17 = smov 8  }
  0x23   :  { %24 = dma.hbm_to_vmem [thread:$0]  %s673_s0, 256, %s19_s8, [#allocation3], %s573_s1, %s573_s1, %s574_s17  }
  0x24   :  { %s575_s20 = smov [#allocation7]   ;;  %s519_s24 = scalar_lea.hbm %s676_s3, 4096 }
  0x25   :  { %s44_s21 = sshll.u32 %s575_s20, 4  ;;  %p520_p2 = scmp.ne.s32.totalorder %s676_s3, %s519_s24  ;;  %s45_s21 = int_to_ptr.vmem [resolvable:$true] %s44_s21 }
  0x26   :  { %p523_p3 = scmp.lt.u32.totalorder %s519_s24, %s676_s3 }
  0x28   :  { %p525_p4 = pnand %p523_p3, %p520_p2 }
  0x2a   :  { %528 = shalt.err (!%p525_p4)
}
  0x2b   :  { %s529_s29 = scalar_lea.vmem %s45_s21, 4096  ;;  %p534_p6 = scmp.lt.s32.totalorder %s45_s21, %s45_s21 }
  0x2c   :  { %p530_p5 = scmp.ne.s32.totalorder %s45_s21, %s529_s29  ;;  %p535_p7 = scmp.lt.s32.totalorder %s529_s29, %s529_s29 }
  0x2e   :  { %p536_p8 = por %p535_p7, %p534_p6 }
  0x30   :  { %p537_p9 = pnand %p536_p8, %p530_p5 }
  0x32   :  { %540 = shalt.err (!%p537_p9)
}
  0x33   :  { %50 = dma.hbm_to_vmem [thread:$0]  %s676_s3, 4096, %s45_s21, [#allocation6], %s573_s1, %s573_s1, %s574_s17  }
  0x34   :  { %563 = dma.done.wait [#allocation3], 256  }
  0x35   :  { %564 = vsyncadd [#allocation3], 4294967040 }
  0x36   :  { %565 = dma.done.wait [#allocation6], 8192  }
  0x37   :  { %566 = vsyncadd [#allocation6], 4294959104  ;;  %v576_v0 = vmov 0.0   ;;  %v65_v1 = vld [vmem:[#allocation5 + $0x8] sm:$0xff]  ;;  %v67_v2 = vld [vmem:[#allocation5 + $0x18] sm:$0xff]  ;;  %s577_s8 = smov [#allocation8]  }
  0x38   :  { %172 = vmatprep.mubr.f32.mxu0 %v576_v0  ;;  %v64_v3 = vld [vmem:[#allocation5] sm:$0xff]  ;;  %v394_v4 = vpack.c.bf16 %v67_v2, %v65_v1  ;;  %v66_v5 = vld [vmem:[#allocation5 + $0x10] sm:$0xff]  ;;  %v69_v6 = vld [vmem:[#allocation5 + $0x28] sm:$0xff]  ;;  %s342_s9 = sshll.u32 %s577_s8, 4  ;;  %s343_s9 = int_to_ptr.vmem [resolvable:$true] %s342_s9 }
  0x39   :  { %v71_v7 = vld [vmem:[#allocation5 + $0x38] sm:$0xff]  ;;  %v396_v8 = vpack.c.bf16 %v66_v5, %v64_v3  ;;  %v68_v10 = vld [vmem:[#allocation5 + $0x20] sm:$0xff]  ;;  %v70_v11 = vld [vmem:[#allocation5 + $0x30] sm:$0xff]  ;;  %s541_s10 = scalar_lea.vmem %s343_s9, 256  ;;  %p546_p11 = scmp.lt.s32.totalorder %s343_s9, %s343_s9 }
  0x3a   :  { %v398_v9 = vpack.c.bf16 %v71_v7, %v69_v6  ;;  %v73_v12 = vld [vmem:[#allocation5 + $0x48] sm:$0xff]  ;;  %395 = vmatprep.subr.bf16.mxu0 %v394_v4  ;;  %v75_v13 = vld [vmem:[#allocation5 + $0x58] sm:$0xff]  ;;  %v400_v14 = vpack.c.bf16 %v70_v11, %v68_v10  ;;  %v72_v16 = vld [vmem:[#allocation5 + $0x40] sm:$0xff]  ;;  %p542_p10 = scmp.ne.s32.totalorder %s343_s9, %s541_s10  ;;  %p547_p12 = scmp.lt.s32.totalorder %s541_s10, %s541_s10 }
  0x3b   :  { %397 = vmatpush1.bf16.msra.mxu0 %v396_v8  ;;  %v402_v15 = vpack.c.bf16 %v75_v13, %v73_v12  ;;  %v74_v17 = vld [vmem:[#allocation5 + $0x50] sm:$0xff]  ;;  %v77_v18 = vld [vmem:[#allocation5 + $0x68] sm:$0xff]  ;;  %v79_v19 = vld [vmem:[#allocation5 + $0x78] sm:$0xff] }
  0x3c   :  { %399 = vmatprep.subr.bf16.mxu0 %v398_v9  ;;  %v404_v20 = vpack.c.bf16 %v74_v17, %v72_v16  ;;  %v406_v21 = vpack.c.bf16 %v79_v19, %v77_v18  ;;  %v76_v22 = vld [vmem:[#allocation5 + $0x60] sm:$0xff]  ;;  %v78_v23 = vld [vmem:[#allocation5 + $0x70] sm:$0xff]  ;;  %v81_v24 = vld [vmem:[#allocation5 + $0x88] sm:$0xff]  ;;  %p548_p13 = por %p547_p12, %p546_p11 }
  0x3d   :  { %v83_v25 = vld [vmem:[#allocation5 + $0x98] sm:$0xff]  ;;  %v237_v26 = vld [vmem:[#allocation7 + $0x80] sm:$0xff]  ;;  %v238_v27 = vld [vmem:[#allocation7 + $0x88] sm:$0xff]  ;;  %v408_v28 = vpack.c.bf16 %v78_v23, %v76_v22 }
  0x3e   :  { %v426_v29 = vpack.c.bf16 %v238_v27, %v237_v26  ;;  %v221_v30 = vld [vmem:[#allocation7] sm:$0xff]  ;;  %v222_v31 = vld [vmem:[#allocation7 + $0x8] sm:$0xff]  ;;  %v410_v32 = vpack.c.bf16 %v83_v25, %v81_v24  ;;  %v82_v34 = vld [vmem:[#allocation5 + $0x90] sm:$0xff]  ;;  %p549_p0 = pnand %p548_p13, %p542_p10 }
  0x3f   :  { %401 = vmatpush1.bf16.msra.mxu0 %v400_v14  ;;  %v80_v33 = vld [vmem:[#allocation5 + $0x80] sm:$0xff]  ;;  %v428_v35 = vpack.c.bf16 %v222_v31, %v221_v30  ;;  %v85_v36 = vld [vmem:[#allocation5 + $0xa8] sm:$0xff]  ;;  %v87_v37 = vld [vmem:[#allocation5 + $0xb8] sm:$0xff] }
  0x40   :  { %403 = vmatprep.subr.bf16.mxu0 %v402_v15  ;;  %427 = vmatprep.subr.bf16.mxu1 %v426_v29  ;;  %v412_v38 = vpack.c.bf16 %v82_v34, %v80_v33  ;;  %v414_v39 = vpack.c.bf16 %v87_v37, %v85_v36  ;;  %v84_v40 = vld [vmem:[#allocation5 + $0xa0] sm:$0xff]  ;;  %v86_v41 = vld [vmem:[#allocation5 + $0xb0] sm:$0xff]  ;;  %v89_v42 = vld [vmem:[#allocation5 + $0xc8] sm:$0xff] }
  0x41   :  { %429 = vmatpush3.bf16.msra.mxu1 %v428_v35  ;;  %v91_v43 = vld [vmem:[#allocation5 + $0xd8] sm:$0xff]  ;;  %v416_v44 = vpack.c.bf16 %v86_v41, %v84_v40  ;;  %v88_v46 = vld [vmem:[#allocation5 + $0xc0] sm:$0xff]  ;;  %v90_v47 = vld [vmem:[#allocation5 + $0xd0] sm:$0xff]  ;;  %v98_v35 = vlaneseq }
  0x42   :  { %v418_v45 = vpack.c.bf16 %v91_v43, %v89_v42  ;;  %v93_v48 = vld [vmem:[#allocation5 + $0xe8] sm:$0xff]  ;;  %v95_v49 = vld [vmem:[#allocation5 + $0xf8] sm:$0xff]  ;;  %v420_v50 = vpack.c.bf16 %v90_v47, %v88_v46  ;;  %v92_v52 = vld [vmem:[#allocation5 + $0xe0] sm:$0xff] }
  0x43   :  { %405 = vmatpush1.bf16.msra.mxu0 %v404_v20  ;;  %v422_v51 = vpack.c.bf16 %v95_v49, %v93_v48  ;;  %v94_v53 = vld [vmem:[#allocation5 + $0xf0] sm:$0xff]  ;;  %v63_v56 = vld [vmem:[#allocation2 + $0x8] sm:$0xff]  ;;  %v241_v63 = vld [vmem:[#allocation7 + $0xa0] sm:$0xff]  ;;  %v99_v36 = vshrl.u32 %v98_v35, 7 }
  0x44   :  { %407 = vmatprep.subr.bf16.mxu0 %v406_v21  ;;  %v424_v54 = vpack.c.bf16 %v94_v53, %v92_v52  ;;  %v62_v55 = vld [vmem:[#allocation2] sm:$0xff]  ;;  %v240_v58 = vld [vmem:[#allocation7 + $0x98] sm:$0xff]  ;;  %v242_v1 = vld [vmem:[#allocation7 + $0xa8] sm:$0xff] }
  0x45   :  { %v239_v57 = vld [vmem:[#allocation7 + $0x90] sm:$0xff]  ;;  %v224_v61 = vld [vmem:[#allocation7 + $0x18] sm:$0xff]  ;;  %v434_v2 = vpack.c.bf16 %v242_v1, %v241_v63  ;;  %v225_v3 = vld [vmem:[#allocation7 + $0x20] sm:$0xff]  ;;  %v100_v37 = vsub.s32 0, %v99_v36 }
  0x46   :  { %v430_v59 = vpack.c.bf16 %v240_v58, %v239_v57  ;;  %v223_v60 = vld [vmem:[#allocation7 + $0x10] sm:$0xff]  ;;  %v226_v4 = vld [vmem:[#allocation7 + $0x28] sm:$0xff]  ;;  %v228_v9 = vld [vmem:[#allocation7 + $0x38] sm:$0xff] }
  0x47   :  { %409 = vmatpush1.bf16.msra.mxu0 %v408_v28  ;;  %v432_v62 = vpack.c.bf16 %v224_v61, %v223_v60  ;;  %v436_v5 = vpack.c.bf16 %v226_v4, %v225_v3  ;;  %v243_v6 = vld [vmem:[#allocation7 + $0xb0] sm:$0xff]  ;;  %v245_v11 = vld [vmem:[#allocation7 + $0xc0] sm:$0xff]  ;;  %v246_v12 = vld [vmem:[#allocation7 + $0xc8] sm:$0xff] }
  0x48   :  { %411 = vmatprep.subr.bf16.mxu0 %v410_v32  ;;  %431 = vmatprep.subr.bf16.mxu1 %v430_v59  ;;  %v227_v8 = vld [vmem:[#allocation7 + $0x30] sm:$0xff]  ;;  %v229_v13 = vld [vmem:[#allocation7 + $0x40] sm:$0xff]  ;;  %v442_v14 = vpack.c.bf16 %v246_v12, %v245_v11  ;;  %v230_v15 = vld [vmem:[#allocation7 + $0x48] sm:$0xff] }
  0x49   :  { %433 = vmatpush3.bf16.msra.mxu1 %v432_v62  ;;  %v440_v10 = vpack.c.bf16 %v228_v9, %v227_v8  ;;  %v247_v16 = vld [vmem:[#allocation7 + $0xd0] sm:$0xff]  ;;  %v248_v17 = vld [vmem:[#allocation7 + $0xd8] sm:$0xff]  ;;  %v444_v18 = vpack.c.bf16 %v230_v15, %v229_v13  ;;  %v249_v22 = vld [vmem:[#allocation7 + $0xe0] sm:$0xff] }
  0x4a   :  { %435 = vmatprep.subr.bf16.mxu1 %v434_v2  ;;  %v446_v19 = vpack.c.bf16 %v248_v17, %v247_v16  ;;  %v231_v20 = vld [vmem:[#allocation7 + $0x50] sm:$0xff]  ;;  %v232_v21 = vld [vmem:[#allocation7 + $0x58] sm:$0xff]  ;;  %v250_v23 = vld [vmem:[#allocation7 + $0xe8] sm:$0xff] }
  0x4b   :  { %413 = vmatpush1.bf16.msra.mxu0 %v412_v38  ;;  %v448_v24 = vpack.c.bf16 %v232_v21, %v231_v20  ;;  %v450_v25 = vpack.c.bf16 %v250_v23, %v249_v22  ;;  %v233_v26 = vld [vmem:[#allocation7 + $0x60] sm:$0xff]  ;;  %v234_v27 = vld [vmem:[#allocation7 + $0x68] sm:$0xff]  ;;  %v251_v28 = vld [vmem:[#allocation7 + $0xf0] sm:$0xff] }
  0x4c   :  { %415 = vmatprep.subr.bf16.mxu0 %v414_v39  ;;  %v252_v29 = vld [vmem:[#allocation7 + $0xf8] sm:$0xff]  ;;  %v452_v30 = vpack.c.bf16 %v234_v27, %v233_v26  ;;  %v235_v32 = vld [vmem:[#allocation7 + $0x70] sm:$0xff]  ;;  %v104_v39 = vsub.s32 1, %v99_v36 }
  0x4d   :  { %437 = vmatpush3.bf16.msra.mxu1 %v436_v5  ;;  %v454_v31 = vpack.c.bf16 %v252_v29, %v251_v28  ;;  %v236_v33 = vld [vmem:[#allocation7 + $0x78] sm:$0xff]  ;;  %v96_v38 = vld [vmem:[%s675_s2] sm:$0x3] }
  0x4e   :  { %v456_v34 = vpack.c.bf16 %v236_v33, %v235_v32  ;;  %v101_v40 = vrot.slane %v96_v38, %v100_v37  ;;  %v105_v41 = vrot.slane %v96_v38, %v104_v39  ;;  %v355_v23 = vld [vmem:[%s677_s4] ss:$0 sm:$0xff] }
  0x4f   :  { %417 = vmatpush1.bf16.msra.mxu0 %v416_v44 }
  0x50   :  { %419 = vmatprep.subr.bf16.mxu0 %v418_v45 }
  0x53   :  { %421 = vmatpush1.bf16.msra.mxu0 %v420_v50 }
  0x54   :  { %423 = vmatprep.subr.bf16.mxu0 %v422_v51 }
  0x57   :  { %425 = vmatpush1.bf16.msra.mxu0 %v424_v54 }
  0x5a   :  { %173 = vmatmul.mubr.f32.vlgmr.msra.gmra.mrb[0].mxu0 %v62_v55 }
  0x5b   :  { %178 = vmatprep.mubr.f32.mxu0 %v576_v0  ;;  %v244_v0 = vld [vmem:[#allocation7 + $0xb8] sm:$0xff] }
  0x5c   :  { %v438_v7 = vpack.c.bf16 %v244_v0, %v243_v6 }
  0x5e   :  { %179 = vmatmul.mubr.f32.gmra.mrb[2].mxu0 %v63_v56  ;;  %439 = vmatprep.subr.bf16.mxu1 %v438_v7 }
  0x5f   :  { %441 = vmatpush3.bf16.msra.mxu1 %v440_v10 }
  0x60   :  { %443 = vmatprep.subr.bf16.mxu1 %v442_v14 }
  0x63   :  { %445 = vmatpush3.bf16.msra.mxu1 %v444_v18 }
  0x64   :  { %447 = vmatprep.subr.bf16.mxu1 %v446_v19 }
  0x67   :  { %449 = vmatpush3.bf16.msra.mxu1 %v448_v24 }
  0x68   :  { %451 = vmatprep.subr.bf16.mxu1 %v450_v25 }
  0x6b   :  { %453 = vmatpush3.bf16.msra.mxu1 %v452_v30 }
  0x6c   :  { %455 = vmatprep.subr.bf16.mxu1 %v454_v31 }
  0x6f   :  { %457 = vmatpush3.bf16.msra.mxu1 %v456_v34 }
 0x12d   :  { %v174_v42 = vpop.f32.mrb[0].mxu0 }
 0x12e   :  { %v175_v43 = vadd.f32 %v174_v42, %v101_v40  ;;  %v176_v44 = vpop.f32.mrb[1].mxu0 }
 0x12f   :  { %v177_v45 = vadd.f32 %v176_v44, %v105_v41 }
 0x130   :  { %v189_v46 = vmul.f32 0.044715, %v175_v43  ;;  %v185_v11 = vmul.f32 0.5, %v175_v43 }
 0x131   :  { %v180_v47 = vpop.f32.mrb[2].mxu0  ;;  %v190_v48 = vmul.f32 0.044715, %v177_v45  ;;  %v186_v9 = vmul.f32 0.5, %v177_v45 }
 0x132   :  { %v193_v49 = vmul.f32 %v189_v46, %v175_v43  ;;  %v181_v50 = vadd.f32 %v180_v47, %v101_v40  ;;  %v182_v51 = vpop.f32.mrb[3].mxu0 }
 0x133   :  { %v183_v52 = vadd.f32 %v182_v51, %v105_v41  ;;  %v194_v53 = vmul.f32 %v190_v48, %v177_v45 }
 0x134   :  { %v191_v54 = vmul.f32 0.044715, %v181_v50  ;;  %v197_v55 = vmul.f32 %v193_v49, %v175_v43  ;;  %v187_v19 = vmul.f32 0.5, %v181_v50 }
 0x135   :  { %v192_v56 = vmul.f32 0.044715, %v183_v52  ;;  %v198_v57 = vmul.f32 %v194_v53, %v177_v45  ;;  %v188_v17 = vmul.f32 0.5, %v183_v52 }
 0x136   :  { %v195_v58 = vmul.f32 %v191_v54, %v181_v50  ;;  %v201_v59 = vadd.f32 %v197_v55, %v175_v43 }
 0x137   :  { %v196_v60 = vmul.f32 %v192_v56, %v183_v52  ;;  %v202_v61 = vadd.f32 %v198_v57, %v177_v45 }
 0x138   :  { %v205_v62 = vmul.f32 0.7978845, %v201_v59  ;;  %v199_v63 = vmul.f32 %v195_v58, %v181_v50 }
 0x139   :  { %v206_v1 = vmul.f32 0.7978845, %v202_v61  ;;  %v200_v2 = vmul.f32 %v196_v60, %v183_v52 }
 0x13a   :  { %467 = vtanh.f32 %v205_v62  ;;  %v203_v3 = vadd.f32 %v199_v63, %v181_v50 }
 0x13b   :  { %469 = vtanh.f32 %v206_v1  ;;  %v204_v4 = vadd.f32 %v200_v2, %v183_v52 }
 0x13c   :  { %v207_v5 = vmul.f32 0.7978845, %v203_v3 }
 0x13d   :  { %v208_v6 = vmul.f32 0.7978845, %v204_v4 }
 0x13e   :  { %471 = vtanh.f32 %v207_v5 }
 0x13f   :  { %473 = vtanh.f32 %v208_v6 }
 0x144   :  { %v468_v0 = vpop.eup %467 }
 0x145   :  { %v470_v7 = vpop.eup %469  ;;  %v213_v8 = vadd.f32 1.0, %v468_v0 }
 0x146   :  { %v214_v10 = vadd.f32 1.0, %v470_v7 }
 0x147   :  { %v217_v15 = vmul.f32 %v213_v8, %v185_v11 }
 0x148   :  { %v472_v12 = vpop.eup %471  ;;  %v218_v13 = vmul.f32 %v214_v10, %v186_v9 }
 0x149   :  { %v474_v14 = vpop.eup %473  ;;  %v215_v16 = vadd.f32 1.0, %v472_v12 }
 0x14a   :  { %324 = vmatprep.mubr.f32.mxu1 %v218_v13  ;;  %v216_v18 = vadd.f32 1.0, %v474_v14 }
 0x14b   :  { %325 = vmatmul.mubr.f32.vlgmr.msra.gmra.mrb[0].mxu1 %v217_v15  ;;  %v219_v21 = vmul.f32 %v215_v16, %v187_v19 }
 0x14c   :  { %v220_v20 = vmul.f32 %v216_v18, %v188_v17 }
 0x14e   :  { %329 = vmatprep.mubr.f32.mxu1 %v220_v20 }
 0x14f   :  { %330 = vmatmul.mubr.f32.gmra.mrb[2].mxu1 %v219_v21 }
 0x21e   :  { %v388_v22 = vpop.f32.mrb[0].mxu1 }
 0x21f   :  { %v389_v24 = vpop.f32.mrb[1].mxu1 }
 0x220   :  { %v390_v25 = vadd.f32 %v389_v24, %v388_v22 }
 0x222   :  { %v327_v26 = vadd.f32 %v390_v25, %v355_v23  ;;  %v391_v27 = vpop.f32.mrb[2].mxu1 }
 0x223   :  { %v392_v28 = vpop.f32.mrb[3].mxu1 }
 0x224   :  { %335 = vst [vmem:[#allocation8] sm:$0xff] %v327_v26  ;;  %v393_v29 = vadd.f32 %v392_v28, %v391_v27 }
 0x226   :  { %v332_v30 = vadd.f32 %v393_v29, %v355_v23 }
 0x228   :  { %336 = vst [vmem:[#allocation8 + $0x8] sm:$0xff] %v332_v30 }
 0x229   :  { %552 = shalt.err (!%p549_p0)
}
 0x22a   :  { %s553_s12 = scalar_lea.hbm %s678_s5, 256 }
 0x22b   :  { %p554_p1 = scmp.ne.s32.totalorder %s678_s5, %s553_s12  ;;  %p557_p2 = scmp.lt.u32.totalorder %s553_s12, %s678_s5 }
 0x22d   :  { %p559_p3 = pnand %p557_p2, %p554_p1 }
 0x22f   :  { %562 = shalt.err (!%p559_p3)
}
 0x230   :  { %348 = dma.vmem_to_hbm [thread:$0]  %s343_s9, 256, %s678_s5, [#allocation4], %s573_s1, %s573_s1, %s574_s17  }
 0x231   :  { %567 = dma.done.wait [#allocation4], 256  }
 0x232   :  { %568 = vsyncadd [#allocation4], 4294967040 }
 0x233   :  { %352 = vsyncpa [#allocation3], 1 }
 0x234   :  { %353 = vsyncpa [#allocation6], 1 }
 0x235   :  { %354 = vsyncpa [#allocation4], 1 }

</bundles_post_ra>
